<compile_context>
chip_gen: v7x
topology: tpu7x:2x2x1
jax: 0.10.0
libtpu: 0.0.40
codegen_flags: <defaults>
</compile_context>

<pallas_src>
import jax
import jax.numpy as jnp
from jax.experimental import pallas as pl
from jax.experimental.pallas import tpu as pltpu


# ---------------------------------------------------------------------------
# Kernels
# ---------------------------------------------------------------------------

def _leaky_relu(x, slope=0.2):
    return jnp.where(x > 0, x, slope * x)


def _sigmoid(x):
    # exp -> EUP slot; stays on the standard lowering path.
    return 1.0 / (1.0 + jnp.exp(-x))


def _fc1_lrelu(z_ref, c_ref, w1z_ref, w1c_ref, b1_ref):
    # cat(z, c) @ W1 + b1 without materializing the concat:
    #   two bf16 dots (MXU fast path) into one f32 accumulator.
    h = jnp.dot(z_ref[...].astype(jnp.bfloat16), w1z_ref[...],
                preferred_element_type=jnp.float32)
    h = h + jnp.dot(c_ref[...].astype(jnp.bfloat16), w1c_ref[...],
                    preferred_element_type=jnp.float32)
    h = h + b1_ref[...].astype(jnp.float32)
    return _leaky_relu(h)                                  # f32 elementwise


def generator_kernel(z_ref, c_ref,
                     w1z_ref, w1c_ref, b1_ref, w3_ref, b3_ref,
                     x_ref, x1_ref):
    x1 = _fc1_lrelu(z_ref, c_ref, w1z_ref, w1c_ref, b1_ref)
    x1_ref[...] = x1.astype(x1_ref.dtype)                  # == self.out
    y = jnp.dot(x1.astype(jnp.bfloat16), w3_ref[...],
                preferred_element_type=jnp.float32) + b3_ref[...].astype(jnp.float32)
    x_ref[...] = _sigmoid(y).astype(x_ref.dtype)


def generator_feedback_kernel(z_ref, c_ref, fb_ref, a1_ref,
                              w1z_ref, w1c_ref, b1_ref, w3_ref, b3_ref,
                              x_ref, x1_ref):
    x1 = _fc1_lrelu(z_ref, c_ref, w1z_ref, w1c_ref, b1_ref)
    x1_ref[...] = x1.astype(x1_ref.dtype)
    h = x1 + a1_ref[...].astype(jnp.float32) * fb_ref[...].astype(jnp.float32)
    y = jnp.dot(h.astype(jnp.bfloat16), w3_ref[...],
                preferred_element_type=jnp.float32) + b3_ref[...].astype(jnp.float32)
    x_ref[...] = _sigmoid(y).astype(x_ref.dtype)


# ---------------------------------------------------------------------------
# Parameters (mirrors weights_init: Linear.weight ~ N(0, 0.02), bias = 0)
# ---------------------------------------------------------------------------

def make_generator_params(key, latent_size, layer_sizes, w_dtype=jnp.bfloat16):
    """fc1: Linear(2*latent, layer_sizes[0]); fc3: Linear(layer_sizes[0], layer_sizes[1]).
    Weights are stored transposed ([in, out]) and the fc1 weight is pre-split into the
    z-part and c-part so the kernel never needs the concatenated input."""
    H0, H1 = layer_sizes
    L = latent_size
    k1z, k1c, k3 = jax.random.split(key, 3)
    std = 0.02
    return {
        "w1z": (jax.random.normal(k1z, (L, H0)) * std).astype(w_dtype),
        "w1c": (jax.random.normal(k1c, (L, H0)) * std).astype(w_dtype),
        "b1": jnp.zeros((1, H0), jnp.float32),
        "w3": (jax.random.normal(k3, (H0, H1)) * std).astype(w_dtype),
        "b3": jnp.zeros((1, H1), jnp.float32),
    }


# ---------------------------------------------------------------------------
# Forward wrapper
# ---------------------------------------------------------------------------

def _round_up(n, m):
    return (n + m - 1) // m * m


def generator_forward(params, z, c, a1=None, feedback_layers=None,
                      block_batch=512):
    """Generator.forward.  Returns (x, x1) where x1 is the module's `self.out`
    (the post-LeakyReLU fc1 activation)."""
    B, L = z.shape
    H0 = params["w1z"].shape[1]
    H1 = params["w3"].shape[1]
    dtype = z.dtype

    # Batch tile: multiple of 8 sublanes, capped so even huge batches pipeline.
    TB = min(block_batch, _round_up(B, 8))
    B_pad = _round_up(B, TB)
    n_tiles = B_pad // TB

    def pad_b(arr):
        if arr.shape[0] == B_pad:
            return arr
        return jnp.pad(arr, ((0, B_pad - arr.shape[0]), (0, 0)))

    zp, cp = pad_b(z), pad_b(c)

    # Activations: tiled along the batch grid axis.
    # Weights/biases: constant block index -> stay VMEM-resident across grid steps.
    def act_spec(width):
        return pl.BlockSpec((TB, width), lambda i: (i, 0))

    def const_spec(shape):
        return pl.BlockSpec(shape, lambda i: (0,) * len(shape))

    weight_args = (params["w1z"], params["w1c"], params["b1"],
                   params["w3"], params["b3"])
    weight_specs = [const_spec(w.shape) for w in weight_args]

    flops = 2 * B_pad * (2 * L * H0 + H0 * H1)
    bytes_accessed = (zp.size * zp.dtype.itemsize + cp.size * cp.dtype.itemsize
                      + sum(int(w.size) * w.dtype.itemsize for w in weight_args)
                      + B_pad * (H0 + H1) * jnp.dtype(dtype).itemsize)

    if feedback_layers is None:
        kernel = generator_kernel
        in_specs = [act_spec(L), act_spec(L)] + weight_specs
        args = (zp, cp) + weight_args
    else:
        kernel = generator_feedback_kernel
        a1_arr = jnp.asarray(a1, jnp.float32).reshape(1, 1)
        fbp = pad_b(feedback_layers)
        in_specs = [act_spec(L), act_spec(L), act_spec(H0),
                    const_spec((1, 1))] + weight_specs
        args = (zp, cp, fbp, a1_arr) + weight_args
        bytes_accessed += int(fbp.size) * fbp.dtype.itemsize + 4

    x, x1 = pl.pallas_call(
        kernel,
        grid=(n_tiles,),
        in_specs=in_specs,
        out_specs=(pl.BlockSpec((TB, H1), lambda i: (i, 0)),
                   pl.BlockSpec((TB, H0), lambda i: (i, 0))),
        out_shape=(jax.ShapeDtypeStruct((B_pad, H1), dtype),
                   jax.ShapeDtypeStruct((B_pad, H0), dtype)),
        compiler_params=pltpu.CompilerParams(
            dimension_semantics=("parallel",)),   # megacore-shard batch on v7x
        cost_estimate=pl.CostEstimate(
            flops=int(flops),
            transcendentals=int(B_pad * H1),
            bytes_accessed=int(bytes_accessed)),
    )(*args)

    if B_pad != B:
        x, x1 = x[:B], x1[:B]
    return x, x1


# ---------------------------------------------------------------------------
# Demo / correctness check
# ---------------------------------------------------------------------------

if __name__ == "__main__":
    B = 16                       # batch
    latent = 16                  # opt.latent_size  (input_size = 2 * latent)
    layer_sizes = (64, 128)      # opt.decoder_layer_sizes

    key = jax.random.PRNGKey(0)
    kz, kc, kf, kp = jax.random.split(key, 4)
    z = jax.random.normal(kz, (B, latent), jnp.float32)
    c = jax.random.normal(kc, (B, latent), jnp.float32)
    fb = jax.random.normal(kf, (B, layer_sizes[0]), jnp.float32)
    a1 = 0.5

    params = make_generator_params(kp, latent, layer_sizes)

    # block_batch=8 so the small demo batch still exercises a multi-step grid.
    x, x1 = generator_forward(params, z, c, block_batch=8)
    xf, _ = generator_forward(params, z, c, a1=a1, feedback_layers=fb,
                              block_batch=8)
    jax.block_until_ready((x, x1, xf))

    # Pure-JAX reference with identical bf16-operand / f32-accumulate math.
    def ref(z, c, a1=None, fb=None):
        h = (jnp.dot(z.astype(jnp.bfloat16), params["w1z"],
                     preferred_element_type=jnp.float32)
             + jnp.dot(c.astype(jnp.bfloat16), params["w1c"],
                       preferred_element_type=jnp.float32)
             + params["b1"])
        x1 = jnp.where(h > 0, h, 0.2 * h)
        h2 = x1 if fb is None else x1 + a1 * fb
        y = jnp.dot(h2.astype(jnp.bfloat16), params["w3"],
                    preferred_element_type=jnp.float32) + params["b3"]
        return 1.0 / (1.0 + jnp.exp(-y)), x1

    x_r, x1_r = ref(z, c)
    xf_r, _ = ref(z, c, a1=a1, fb=fb)

    assert x.shape == (B, layer_sizes[1]) and x1.shape == (B, layer_sizes[0])
    assert jnp.allclose(x, x_r, atol=2e-3, rtol=2e-3)
    assert jnp.allclose(x1, x1_r, atol=2e-3, rtol=2e-3)
    assert jnp.allclose(xf, xf_r, atol=2e-3, rtol=2e-3)

    print("KERNEL_OK")
</pallas_src>

<mosaic_0001>
module attributes {stable_mosaic.version = 11 : i64} {
  func.func @generator_kernel(%arg0: i32, %arg1: memref<8x16xf32, #tpu.memory_space<vmem>>, %arg2: memref<8x16xf32, #tpu.memory_space<vmem>>, %arg3: memref<16x64xbf16, #tpu.memory_space<vmem>>, %arg4: memref<16x64xbf16, #tpu.memory_space<vmem>>, %arg5: memref<1x64xf32, #tpu.memory_space<vmem>>, %arg6: memref<64x128xbf16, #tpu.memory_space<vmem>>, %arg7: memref<1x128xf32, #tpu.memory_space<vmem>>, %arg8: memref<8x128xf32, #tpu.memory_space<vmem>>, %arg9: memref<8x64xf32, #tpu.memory_space<vmem>>) attributes {dimension_semantics = [#tpu.dimension_semantics<parallel>], iteration_bounds = array<i64: 2>, scalar_prefetch = 0 : i64, scratch_operands = 0 : i64, tpu.core_type = #tpu.core_type<tc>, window_params = [{transform_indices = @transform_0, window_bounds = array<i64: 8, 16>}, {transform_indices = @transform_1, window_bounds = array<i64: 8, 16>}, {pipeline_mode = #tpu.pipeline_mode<synchronous>, transform_indices = @transform_2, window_bounds = array<i64: 16, 64>}, {pipeline_mode = #tpu.pipeline_mode<synchronous>, transform_indices = @transform_3, window_bounds = array<i64: 16, 64>}, {pipeline_mode = #tpu.pipeline_mode<synchronous>, transform_indices = @transform_4, window_bounds = array<i64: 1, 64>}, {pipeline_mode = #tpu.pipeline_mode<synchronous>, transform_indices = @transform_5, window_bounds = array<i64: 64, 128>}, {pipeline_mode = #tpu.pipeline_mode<synchronous>, transform_indices = @transform_6, window_bounds = array<i64: 1, 128>}, {transform_indices = @transform_7, window_bounds = array<i64: 8, 128>}, {transform_indices = @transform_8, window_bounds = array<i64: 8, 64>}]} {
    %c0 = arith.constant 0 : index
    %c0_0 = arith.constant 0 : index
    %0 = vector.load %arg1[%c0, %c0_0] : memref<8x16xf32, #tpu.memory_space<vmem>>, vector<8x16xf32>
    %1 = arith.truncf %0 : vector<8x16xf32> to vector<8x16xbf16>
    %c0_1 = arith.constant 0 : index
    %c0_2 = arith.constant 0 : index
    %2 = vector.load %arg3[%c0_1, %c0_2] : memref<16x64xbf16, #tpu.memory_space<vmem>>, vector<16x64xbf16>
    %cst = arith.constant dense<0.000000e+00> : vector<8x64xf32>
    %3 = tpu.matmul %1, %2, %cst {dimension_numbers = #tpu.dot_dimension_numbers<[1], [0], [0], [1], [0, 0, 1, 1], [], []>} : vector<8x16xbf16>, vector<16x64xbf16>, vector<8x64xf32> -> vector<8x64xf32>
    %c0_3 = arith.constant 0 : index
    %c0_4 = arith.constant 0 : index
    %4 = vector.load %arg2[%c0_3, %c0_4] : memref<8x16xf32, #tpu.memory_space<vmem>>, vector<8x16xf32>
    %5 = arith.truncf %4 : vector<8x16xf32> to vector<8x16xbf16>
    %c0_5 = arith.constant 0 : index
    %c0_6 = arith.constant 0 : index
    %6 = vector.load %arg4[%c0_5, %c0_6] : memref<16x64xbf16, #tpu.memory_space<vmem>>, vector<16x64xbf16>
    %cst_7 = arith.constant dense<0.000000e+00> : vector<8x64xf32>
    %7 = tpu.matmul %5, %6, %cst_7 {dimension_numbers = #tpu.dot_dimension_numbers<[1], [0], [0], [1], [0, 0, 1, 1], [], []>} : vector<8x16xbf16>, vector<16x64xbf16>, vector<8x64xf32> -> vector<8x64xf32>
    %8 = arith.addf %3, %7 : vector<8x64xf32>
    %c0_8 = arith.constant 0 : index
    %c0_9 = arith.constant 0 : index
    %9 = vector.load %arg5[%c0_8, %c0_9] : memref<1x64xf32, #tpu.memory_space<vmem>>, vector<1x64xf32>
    %10 = vector.broadcast %9 : vector<1x64xf32> to vector<8x64xf32>
    %11 = arith.addf %8, %10 : vector<8x64xf32>
    %cst_10 = arith.constant 0.000000e+00 : f32
    %12 = vector.broadcast %cst_10 : f32 to vector<8x64xf32>
    %13 = arith.cmpf ogt, %11, %12 : vector<8x64xf32>
    %cst_11 = arith.constant 2.000000e-01 : f32
    %14 = vector.broadcast %cst_11 : f32 to vector<8x64xf32>
    %15 = arith.mulf %14, %11 : vector<8x64xf32>
    %16 = arith.select %13, %11, %15 : vector<8x64xi1>, vector<8x64xf32>
    %c0_12 = arith.constant 0 : index
    %c0_13 = arith.constant 0 : index
    %17 = vector.load %arg9[%c0_12, %c0_13] : memref<8x64xf32, #tpu.memory_space<vmem>>, vector<8x64xf32>
    tpu.vector_store %arg9[%c0_12, %c0_13], %16 {strides = array<i32>} : memref<8x64xf32, #tpu.memory_space<vmem>>, vector<8x64xf32>,
    %18 = arith.truncf %16 : vector<8x64xf32> to vector<8x64xbf16>
    %c0_14 = arith.constant 0 : index
    %c0_15 = arith.constant 0 : index
    %19 = vector.load %arg6[%c0_14, %c0_15] : memref<64x128xbf16, #tpu.memory_space<vmem>>, vector<64x128xbf16>
    %cst_16 = arith.constant dense<0.000000e+00> : vector<8x128xf32>
    %20 = tpu.matmul %18, %19, %cst_16 {dimension_numbers = #tpu.dot_dimension_numbers<[1], [0], [0], [1], [0, 0, 1, 1], [], []>} : vector<8x64xbf16>, vector<64x128xbf16>, vector<8x128xf32> -> vector<8x128xf32>
    %c0_17 = arith.constant 0 : index
    %c0_18 = arith.constant 0 : index
    %21 = vector.load %arg7[%c0_17, %c0_18] : memref<1x128xf32, #tpu.memory_space<vmem>>, vector<1x128xf32>
    %22 = vector.broadcast %21 : vector<1x128xf32> to vector<8x128xf32>
    %23 = arith.addf %20, %22 : vector<8x128xf32>
    %cst_19 = arith.constant 0.000000e+00 : f32
    %24 = vector.broadcast %cst_19 : f32 to vector<8x128xf32>
    %25 = arith.subf %24, %23 : vector<8x128xf32>
    %26 = math.exp %25 : vector<8x128xf32>
    %cst_20 = arith.constant 1.000000e+00 : f32
    %27 = vector.broadcast %cst_20 : f32 to vector<8x128xf32>
    %28 = arith.addf %27, %26 : vector<8x128xf32>
    %cst_21 = arith.constant 1.000000e+00 : f32
    %29 = vector.broadcast %cst_21 : f32 to vector<8x128xf32>
    %30 = arith.divf %29, %28 : vector<8x128xf32>
    %c0_22 = arith.constant 0 : index
    %c0_23 = arith.constant 0 : index
    %31 = vector.load %arg8[%c0_22, %c0_23] : memref<8x128xf32, #tpu.memory_space<vmem>>, vector<8x128xf32>
    tpu.vector_store %arg8[%c0_22, %c0_23], %30 {strides = array<i32>} : memref<8x128xf32, #tpu.memory_space<vmem>>, vector<8x128xf32>,
    return
  }
  func.func @transform_0(%arg0: i32) -> (i32, i32) {
    %c0_i32 = arith.constant 0 : i32
    %c0_i32_0 = arith.constant 0 : i32
    return %arg0, %c0_i32 : i32, i32
  }
  func.func @transform_1(%arg0: i32) -> (i32, i32) {
    %c0_i32 = arith.constant 0 : i32
    %c0_i32_0 = arith.constant 0 : i32
    return %arg0, %c0_i32 : i32, i32
  }
  func.func @transform_2(%arg0: i32) -> (i32, i32) {
    %c0_i32 = arith.constant 0 : i32
    %c0_i32_0 = arith.constant 0 : i32
    %c0_i32_1 = arith.constant 0 : i32
    return %c0_i32, %c0_i32_0 : i32, i32
  }
  func.func @transform_3(%arg0: i32) -> (i32, i32) {
    %c0_i32 = arith.constant 0 : i32
    %c0_i32_0 = arith.constant 0 : i32
    %c0_i32_1 = arith.constant 0 : i32
    return %c0_i32, %c0_i32_0 : i32, i32
  }
  func.func @transform_4(%arg0: i32) -> (i32, i32) {
    %c0_i32 = arith.constant 0 : i32
    %c0_i32_0 = arith.constant 0 : i32
    %c0_i32_1 = arith.constant 0 : i32
    return %c0_i32, %c0_i32_0 : i32, i32
  }
  func.func @transform_5(%arg0: i32) -> (i32, i32) {
    %c0_i32 = arith.constant 0 : i32
    %c0_i32_0 = arith.constant 0 : i32
    %c0_i32_1 = arith.constant 0 : i32
    return %c0_i32, %c0_i32_0 : i32, i32
  }
  func.func @transform_6(%arg0: i32) -> (i32, i32) {
    %c0_i32 = arith.constant 0 : i32
    %c0_i32_0 = arith.constant 0 : i32
    %c0_i32_1 = arith.constant 0 : i32
    return %c0_i32, %c0_i32_0 : i32, i32
  }
  func.func @transform_7(%arg0: i32) -> (i32, i32) {
    %c0_i32 = arith.constant 0 : i32
    %c0_i32_0 = arith.constant 0 : i32
    return %arg0, %c0_i32 : i32, i32
  }
  func.func @transform_8(%arg0: i32) -> (i32, i32) {
    %c0_i32 = arith.constant 0 : i32
    %c0_i32_0 = arith.constant 0 : i32
    return %arg0, %c0_i32 : i32, i32
  }
}

</mosaic_0001>

<bundles_post_ra>
// kernel: tpu_custom_call.1
= control target key start
LH: loop header
LB: loop body
LE: loop exit
PB: predicated region body
PF: predicated region fallthrough
CT: control target
= control target key end

     0   :  { %s1536_s0 = inlined_call_operand.hbm [shape: f32[16,16], index: 0, kind: input, shape index: {}]   ;;  %s1537_s1 = inlined_call_operand.hbm [shape: f32[16,16], index: 1, kind: input, shape index: {}]   ;;  %s1538_s2 = inlined_call_operand.hbm [shape: bf16[16,64], index: 2, kind: input, shape index: {}]   ;;  %s1539_s3 = inlined_call_operand.vmem [shape: bf16[16,64], index: 3, kind: input, shape index: {}]   ;;  %s1540_s4 = inlined_call_operand.vmem [shape: f32[1,64], index: 4, kind: input, shape index: {}]   ;;  %s1541_s5 = inlined_call_operand.hbm [shape: bf16[64,128], index: 5, kind: input, shape index: {}]   ;;  %s1542_s6 = inlined_call_operand.vmem [shape: f32[1,128], index: 6, kind: input, shape index: {}]   ;;  %s1543_s7 = inlined_call_operand.hbm [shape: f32[16,128], index: 7, kind: output, shape index: {0}]   ;;  %s1544_s8 = inlined_call_operand.hbm [shape: f32[16,64], index: 8, kind: output, shape index: {1}]  }
   0x1   :  { %1552 = sst [smem:[#allocation22_spill]] %s1538_s2 }
   0x2   :  { %1553 = sst [smem:[#allocation23_spill]] %s1541_s5 }
   0x3   :  { %14 = vsyncpa [#allocation3], 0 }
   0x4   :  { %16 = vsyncpa [#allocation3 + $0x1], 0 }
   0x5   :  { %17 = vsyncpa [#allocation6], 0 }
   0x6   :  { %19 = vsyncpa [#allocation6 + $0x1], 0 }
   0x7   :  { %20 = vsyncpa [#allocation9], 0 }
   0x8   :  { %21 = vsyncpa [#allocation4], 0 }
   0x9   :  { %23 = vsyncpa [#allocation4 + $0x1], 0 }
   0xa   :  { %24 = vsyncpa [#allocation12], 0 }
   0xb   :  { %26 = vsyncpa [#allocation12 + $0x1], 0  ;;  %s1225_s27 = smov 0   ;;  %s1227_s28 = smov 0  }
   0xc   :  { %s1229_s29 = smov 0   ;;  %s1231_s30 = smov 0  }
   0xd LB: > { %1554 = sst [smem:[#allocation19_spill]] %s1164_s29  ;;  %s1246_s9 = sadd.s32 4294967295, %s1168_s30   ;;  %s1168_s30 = sphi %s1231_s30, %s1575_s30   ;;  %s1164_s29 = sphi %s1229_s29, %s1577_s29   ;;  %s1160_s28 = sphi %s1227_s28, %s1579_s28   ;;  %s1156_s27 = sphi %s1225_s27, %s1578_s27  }
   0xe   : > { %s785_s10 = sadd.s32 4294967294, %s1168_s30   ;;  %p52_p0 = scmp.ne.s32.totalorder %s1160_s28, %s1156_s27 }
   0xf   : > { %p1545_p1 = scmp.eq.s32.totalorder %s1246_s9, 0  ;;  %p213_p3 = scmp.eq.s32.totalorder %s785_s10, 1 }
  0x10   : > { %p786_p5 = scmp.ge.s32.totalorder %s1168_s30, 1  ;;  %p246_p7 = scmp.lt.s32.totalorder %s1168_s30, 3 }
  0x11   : > { %p1255_p4 = por %p1545_p1, %p52_p0  ;;  %p1260_p6 = por %p213_p3, %p52_p0 }
  0x12   : > { %p1265_p8 = pnand %p786_p5, %p246_p7  ;;  %s1170_s14 = smov [#allocation7]  }
  0x13   : > { %s1555_s11 = scalar_select %p1255_p4, 1, 0 }
  0x14   : > { %s1556_s12 = scalar_select %p1260_p6, 1, 0 }
  0x15   : > { %s1557_s13 = scalar_select %p1265_p8, 1, 0 }
  0x16   : > { %s258_s15 = sshll.u32 %s1170_s14, 4  ;;  %p867_p9 = pneg %p1265_p8  ;;  %s1269_s15 = int_to_ptr.vmem [resolvable:$true] %s258_s15 }
  0x17   : > { %s1171_s17 = smov [#allocation8]   ;;  %s1559_s2 = sld [smem:[#allocation22_spill]] }
  0x18   : > { %p1276_p11 = pnand %p867_p9, %p1545_p1  ;;  %s277_s18 = sshll.u32 %s1171_s17, 4  ;;  %s1280_s18 = int_to_ptr.vmem [resolvable:$true] %s277_s18 }
  0x1a   : > { %p944_p13 = pneg %p1276_p11 }
  0x1d   : > { %s942_s21 = scalar_lea.hbm %s1559_s2, 128 }
  0x1e   : > { %p943_p12 = scmp.ne.s32.totalorder %s1559_s2, %s942_s21  ;;  %p949_p5 = scmp.lt.u32.totalorder %s942_s21, %s1559_s2 }
  0x20   : > { %p945_p0 = pnand %p944_p13, %p943_p12 }
  0x22   : > { %p946_p3 = pneg %p945_p0 }
  0x24   : > { %p951_p7 = pnand %p949_p5, %p946_p3 }
  0x26   : > { %954 = shalt.err (!%p951_p7)
}
  0x27   : > { %s955_s26 = scalar_lea.vmem %s1269_s15, 128  ;;  %p963_p2 = scmp.lt.s32.totalorder %s1269_s15, %s1269_s15 }
  0x28   : > { %p956_p9 = scmp.ne.s32.totalorder %s1269_s15, %s955_s26  ;;  %p964_p12 = scmp.lt.s32.totalorder %s955_s26, %s955_s26 }
  0x2a   : > { %p958_p10 = pnand %p956_p9, %p944_p13  ;;  %p965_p0 = por %p964_p12, %p963_p2 }
  0x2c   : > { %p959_p1 = pneg %p958_p10 }
  0x2e   : > { %p966_p6 = pnand %p965_p0, %p959_p1 }
  0x30   : > { %969 = shalt.err (!%p966_p6)
}
  0x31   : > { %s1172_s10 = smov 64   ;;  %s1173_s14 = smov 4  }
  0x32   : > { %870 = dma.hbm_to_vmem [thread:$0]  (!%p1276_p11), %s1559_s2, 128, %s1269_s15, [#allocation6], %s1172_s10, %s1172_s10, %s1173_s14  }
  0x33   : > { %s1560_s5 = sld [smem:[#allocation23_spill]] }
  0x39   : > { %s970_s22 = scalar_lea.hbm %s1560_s5, 512 }
  0x3a   : > { %p971_p2 = scmp.ne.s32.totalorder %s1560_s5, %s970_s22  ;;  %p977_p10 = scmp.lt.u32.totalorder %s970_s22, %s1560_s5 }
  0x3c   : > { %p973_p1 = pnand %p971_p2, %p944_p13 }
  0x3e   : > { %p974_p6 = pneg %p973_p1 }
  0x40   : > { %p979_p3 = pnand %p977_p10, %p974_p6 }
  0x42   : > { %982 = shalt.err (!%p979_p3)
}
  0x43   : > { %s983_s15 = scalar_lea.vmem %s1280_s18, 512  ;;  %p991_p12 = scmp.lt.s32.totalorder %s1280_s18, %s1280_s18 }
  0x44   : > { %p984_p5 = scmp.ne.s32.totalorder %s1280_s18, %s983_s15  ;;  %p992_p0 = scmp.lt.s32.totalorder %s983_s15, %s983_s15 }
  0x46   : > { %p986_p7 = pnand %p984_p5, %p944_p13  ;;  %p993_p2 = por %p992_p0, %p991_p12 }
  0x48   : > { %p987_p9 = pneg %p986_p7 }
  0x4a   : > { %p994_p1 = pnand %p993_p2, %p987_p9 }
  0x4c   : > { %997 = shalt.err (!%p994_p1)
}
  0x4d   : > { %873 = dma.hbm_to_vmem [thread:$0]  (!%p1276_p11), %s1560_s5, 512, %s1280_s18, [#allocation9], %s1172_s10, %s1172_s10, %s1173_s14  }
  0x4e   : > { %s1335_s20 = sadd.s32 1, %s1168_s30   ;;  %s39_s16 = sadd.s32 1, %s1164_s29 }
  0x4f   : > { %1561 = sst [smem:[#allocation20_spill]] %s1335_s20  ;;  %s36_s21 = ssub.s32 %s1168_s30, %s1335_s20 }
  0x50   : > { %p46_p13 = scmp.ne.s32.totalorder %s1164_s29, %s1160_s28  ;;  %p37_p6 = scmp.eq.s32.totalorder %s36_s21, 0 }
  0x51   : > { %p47_p10 = scmp.eq.s32.totalorder %s1168_s30, 0  ;;  %p1562_p3 = scmp.eq.s32.totalorder %s1246_s9, 1 }
  0x52   : > { %p890_p7 = scmp.lt.s32.totalorder %s1168_s30, 2  ;;  %s294_s24 = sand.u32 1, %s1164_s29  }
  0x53   : > { %p1345_p5 = por %p1562_p3, %p46_p13  ;;  %p48_p9 = por %p47_p10, %p46_p13 }
  0x54   : > { %s1351_s23 = scalar_select %p37_p6, %s1164_s29, %s39_s16  }
  0x55   : > { %s1563_s22 = scalar_select %p1345_p5, 1, 0 }
  0x56   : > { %1564 = sst [smem:[#allocation21_spill]] %s1351_s23  ;;  %s1354_s18 = sshll.u32 %s294_s24, 3 }
  0x57   : > { %s791_s10 = sshll.u32 %s1168_s30, 7  ;;  %s298_s15 = scalar_lea.vmem [#allocation2], %s1354_s18 }
  0x58   : > { %s1360_s26 = scalar_lea.hbm %s1536_s0, %s791_s10  ;;  %s305_s17 = sshll.u32 %s298_s15, 4  ;;  %s1363_s17 = int_to_ptr.vmem [resolvable:$true] %s305_s17 }
  0x59   : > { %p1365_p11 = pnand %p890_p7, %p48_p9  ;;  %s1372_s14 = scalar_lea.hbm %s1537_s1, %s791_s10 }
  0x5a   : > { %s312_s25 = sand.u32 1, %s1168_s30   ;;  %s295_s2 = scalar_lea.sflag [#allocation3], %s294_s24 }
  0x5b   : > { %s998_s5 = scalar_lea.hbm %s1360_s26, 128  ;;  %p1000_p0 = pneg %p1365_p11 }
  0x5c   : > { %p999_p12 = scmp.ne.s32.totalorder %s1360_s26, %s998_s5  ;;  %s1003_s29 = scalar_lea.hbm %s1536_s0, 256 }
  0x5d   : > { %p1004_p13 = scmp.lt.u32.totalorder %s1360_s26, %s1536_s0  ;;  %p1005_p6 = scmp.lt.u32.totalorder %s1003_s29, %s998_s5 }
  0x5e   : > { %p1001_p2 = pnand %p1000_p0, %p999_p12  ;;  %p1007_p3 = scmp.lt.u32.totalorder %s998_s5, %s1360_s26 }
  0x5f   : > { %p1006_p10 = por %p1005_p6, %p1004_p13 }
  0x60   : > { %p1002_p1 = pneg %p1001_p2 }
  0x61   : > { %p1008_p7 = por %p1007_p3, %p1006_p10 }
  0x63   : > { %p1009_p9 = pnand %p1008_p7, %p1002_p1 }
  0x65   : > { %1012 = shalt.err (!%p1009_p9)
}
  0x66   : > { %s1013_s24 = scalar_lea.vmem %s1363_s17, 128  ;;  %s1174_s23 = smov [#allocation2]  }
  0x67   : > { %p1014_p12 = scmp.ne.s32.totalorder %s1363_s17, %s1013_s24  ;;  %s1018_s10 = sshll.u32 %s1174_s23, 4  ;;  %s1019_s10 = int_to_ptr.vmem [resolvable:$false] %s1018_s10 }
  0x68   : > { %s1020_s20 = scalar_lea.vmem %s1019_s10, 256  ;;  %p1021_p4 = scmp.lt.s32.totalorder %s1363_s17, %s1019_s10 }
  0x69   : > { %p1016_p2 = pnand %p1014_p12, %p1000_p0  ;;  %p1022_p13 = scmp.lt.s32.totalorder %s1020_s20, %s1013_s24 }
  0x6b   : > { %p1017_p5 = pneg %p1016_p2  ;;  %p1023_p6 = por %p1022_p13, %p1021_p4 }
  0x6d   : > { %p1024_p10 = pnand %p1023_p6, %p1017_p5 }
  0x6f   : > { %1027 = shalt.err (!%p1024_p10)
}
  0x70   : > { %877 = dma.hbm_to_vmem [thread:$0]  (!%p1365_p11), %s1360_s26, 128, %s1363_s17, %s295_s2  }
  0x71   : > { %s316_s5 = scalar_lea.vmem [#allocation5], %s1354_s18  ;;  %s313_s21 = scalar_lea.sflag [#allocation6], %s312_s25 }
  0x72   : > { %s323_s29 = sshll.u32 %s316_s5, 4  ;;  %s1028_s15 = scalar_lea.hbm %s1372_s14, 128  ;;  %s324_s29 = int_to_ptr.vmem [resolvable:$true] %s323_s29 }
  0x73   : > { %p1029_p4 = scmp.ne.s32.totalorder %s1372_s14, %s1028_s15  ;;  %s1033_s23 = scalar_lea.hbm %s1537_s1, 256 }
  0x74   : > { %p1034_p3 = scmp.lt.u32.totalorder %s1372_s14, %s1537_s1  ;;  %p1035_p7 = scmp.lt.u32.totalorder %s1033_s23, %s1028_s15 }
  0x75   : > { %p1031_p5 = pnand %p1029_p4, %p1000_p0  ;;  %p1037_p12 = scmp.lt.u32.totalorder %s1028_s15, %s1372_s14 }
  0x76   : > { %p1036_p9 = por %p1035_p7, %p1034_p3 }
  0x77   : > { %p1032_p1 = pneg %p1031_p5 }
  0x78   : > { %p1038_p2 = por %p1037_p12, %p1036_p9 }
  0x7a   : > { %p1039_p13 = pnand %p1038_p2, %p1032_p1 }
  0x7c   : > { %1042 = shalt.err (!%p1039_p13)
}
  0x7d   : > { %s1043_s2 = scalar_lea.vmem %s324_s29, 128  ;;  %s1175_s18 = smov [#allocation5]  }
  0x7e   : > { %p1044_p6 = scmp.ne.s32.totalorder %s324_s29, %s1043_s2  ;;  %s1048_s26 = sshll.u32 %s1175_s18, 4  ;;  %s1049_s26 = int_to_ptr.vmem [resolvable:$false] %s1048_s26 }
  0x7f   : > { %s1050_s17 = scalar_lea.vmem %s1049_s26, 256  ;;  %p1051_p5 = scmp.lt.s32.totalorder %s324_s29, %s1049_s26 }
  0x80   : > { %p1046_p10 = pnand %p1044_p6, %p1000_p0  ;;  %p1052_p8 = scmp.lt.s32.totalorder %s1050_s17, %s1043_s2 }
  0x82   : > { %p1047_p4 = pneg %p1046_p10  ;;  %p1053_p3 = por %p1052_p8, %p1051_p5 }
  0x84   : > { %p1054_p7 = pnand %p1053_p3, %p1047_p4 }
  0x86   : > { %1057 = shalt.err (!%p1054_p7)
}
  0x87   : > { %880 = dma.hbm_to_vmem [thread:$0]  (!%p1365_p11), %s1372_s14, 128, %s324_s29, %s313_s21  }
  0x88   : > { %p1566_p1 = scmp.ne.s32.totalorder %s1557_s13, 0 }
  0x89   : > { %s1425_s25 = sand.u32 (!%p1566_p1), 1, %s1160_s28   ;;  %p1567_p8 = scmp.ne.s32.totalorder (!%p1566_p1), %s1555_s11, 0 }
  0x8a   : > { %332 = sbr.rel (%p1566_p1) target bundleno = 647 (0x287), region = 48  ;;  %s1428_s5 = sshll.u32 (!%p1566_p1), %s1425_s25, 3 }
  0x8b   : > { %s335_s15 = scalar_lea.sflag (!%p1566_p1), [#allocation3], %s1425_s25  ;;  %s338_s16 = scalar_lea.vmem (!%p1566_p1), [#allocation2], %s1428_s5 }
  0x91   : > { %1131 = dma.done.wait (%p1567_p8), %s335_s15, 128  }
  0x92   : > { %1133 = vsyncadd (%p1567_p8), %s335_s15, 4294967168  ;;  %s343_s13 = sand.u32 1, %s1246_s9   ;;  %s347_s14 = scalar_lea.vmem [#allocation5], %s1428_s5 }
  0x93   : > { %s344_s19 = scalar_lea.sflag [#allocation6], %s343_s13 }
  0x94   : > { %1135 = dma.done.wait (%p1567_p8), %s344_s19, 128  }
  0x95   : > { %1137 = vsyncadd (%p1567_p8), %s344_s19, 4294967168  ;;  %p1568_p11 = scmp.eq.s32.totalorder %s1246_s9, 0 }
  0x97   : > { %1139 = dma.done.wait (%p1568_p11), [#allocation6], 128   ;;  %p1569_p0 = pmov %p1568_p11 }
  0x99   : > { %1141 = vsyncadd (%p1569_p0), [#allocation6], 4294967168  ;;  %p1570_p9 = pmov %p1569_p0 }
  0x9a   : > { %p1571_p12 = pmov %p1569_p0 }
  0x9b   : > { %1143 = dma.done.wait (%p1570_p9), [#allocation9], 512  }
  0x9c   : > { %1145 = vsyncadd (%p1571_p12), [#allocation9], 4294966784  ;;  %v1176_v0 = vmov 0.0   ;;  %vm1177_vm0 = vmmov 0   ;;  %v932_v1 = vld [vmem:[%s1539_s3] sm:$0xff]   ;;  %v403_v2 = vld [vmem:[%s347_s14] sm:$0xff] }
  0x9d   : > { %827 = vmatprep.subr.bf16.mxu1 %v1176_v0  ;;  %829 = vmatprep.mubr.msk.bf16.mxu1 %vm1177_vm0, %v1176_v0  ;;  %v404_v3 = vpack.c.bf16 %v403_v2, %v403_v2  ;;  %vm413_vm1 = vcmask 130048   ;;  %v933_v4 = vld [vmem:[#allocation7] sm:$0xff]   ;;  %v934_v7 = vld [vmem:[#allocation8] sm:$0xff]   ;;  %v935_v8 = vld [vmem:[#allocation8 + $0x8] sm:$0xff]   ;;  %vm517_vm3 = vcmask 523264   ;;  %s397_s23 = scalar_lea.vmem [#allocation11], %s1428_s5 }
  0x9e   : > { %839 = vmatprep.subr.bf16.mxu0 %v1176_v0  ;;  %847 = vmatprep.mubr.msk.bf16.mxu0 %vm1177_vm0, %v1176_v0  ;;  %v399_v5 = vld [vmem:[%s338_s16] sm:$0xff]  ;;  %v936_v9 = vld [vmem:[#allocation8 + $0x10] sm:$0xff]   ;;  %s814_s10 = sshll.u32 %s1246_s9, 7  ;;  %s641_s26 = sshll.u32 %s397_s23, 4  ;;  %s642_s26 = int_to_ptr.vmem [resolvable:$true] %s641_s26 }
  0x9f   : > { %828 = vmatpush3.bf16.msra.mxu1 %v932_v1  ;;  %v400_v6 = vpack.c.bf16 %v399_v5, %v399_v5  ;;  %840 = vmatpush3.bf16.msra.mxu0 %v934_v7  ;;  %v937_v10 = vld [vmem:[#allocation8 + $0x18] sm:$0xff]   ;;  %s1463_s18 = scalar_lea.hbm %s1544_s8, %s814_s10  ;;  %s615_s17 = scalar_lea.sflag [#allocation12], %s1425_s25 }
  0xa0   : > { %833 = vmatprep.subr.bf16.mxu1 %v1176_v0  ;;  %841 = vmatprep.subr.bf16.mxu0 %v1176_v0  ;;  %v805_v16 = vld [vmem:[%s1540_s4] ss:$0 sm:$0xff]  ;;  %s1058_s15 = scalar_lea.vmem %s642_s26, 128  ;;  %p1572_p13 = scmp.ne.s32.totalorder %s1563_s22, 0 }
  0xa1   : > { %p1059_p2 = scmp.ne.s32.totalorder %s642_s26, %s1058_s15  ;;  %s1178_s16 = smov [#allocation11]  }
  0xa2   : > { %830 = vmatmul.mubr.msk.bf16.vlgmr.msra.gmra.mrb[0].mxu1 %vm413_vm1, %v404_v3  ;;  %s1062_s13 = sshll.u32 %s1178_s16, 4  ;;  %s1063_s13 = int_to_ptr.vmem [resolvable:$false] %s1062_s13 }
  0xa3   : > { %834 = vmatpush3.bf16.msra.mxu1 %v933_v4  ;;  %835 = vmatprep.mubr.msk.bf16.mxu1 %vm1177_vm0, %v1176_v0  ;;  %p1060_p6 = pnand %p1059_p2, %p1572_p13  ;;  %s1064_s19 = scalar_lea.vmem %s1063_s13, 256 }
  0xa4   : > { %842 = vmatpush3.bf16.msra.mxu0 %v935_v8  ;;  %p1065_p4 = scmp.lt.s32.totalorder %s642_s26, %s1063_s13  ;;  %p1066_p5 = scmp.lt.s32.totalorder %s1064_s19, %s1058_s15 }
  0xa5   : > { %843 = vmatprep.subr.bf16.mxu0 %v1176_v0  ;;  %p1061_p10 = pneg %p1060_p6 }
  0xa6   : > { %p1067_p3 = por %p1066_p5, %p1065_p4 }
  0xa8   : > { %844 = vmatpush3.bf16.msra.mxu0 %v936_v9  ;;  %p1068_p7 = pnand %p1067_p3, %p1061_p10 }
  0xa9   : > { %845 = vmatprep.subr.bf16.mxu0 %v1176_v0 }
  0xaa   : > { %836 = vmatmul.mubr.msk.bf16.vlgmr.msra.gmra.mrb[4].mxu1 %vm413_vm1, %v400_v6 }
  0xac   : > { %846 = vmatpush3.bf16.msra.mxu0 %v937_v10 }
 0x175   : > { %v451_v11 = vpop.f32.mrb[0].mxu1 }
 0x176   : > { %v831_v12 = vpop.f32.mrb[1].mxu1 }
 0x177   : > { %v454_v13 = vpop.f32.mrb[2].mxu1 }
 0x178   : > { %v832_v14 = vpop.f32.mrb[3].mxu1 }
 0x17d   : > { %v500_v15 = vpop.f32.mrb[4].mxu1 }
 0x17e   : > { %v501_v17 = vadd.f32 %v500_v15, %v451_v11  ;;  %v837_v18 = vpop.f32.mrb[5].mxu1 }
 0x17f   : > { %v503_v19 = vpop.f32.mrb[6].mxu1 }
 0x180   : > { %v513_v20 = vadd.f32 %v805_v16, %v501_v17  ;;  %v838_v21 = vpop.f32.mrb[7].mxu1 }
 0x182   : > { %vm514_vm2 = vcmp.gt.f32.partialorder %v513_v20, 0.0  ;;  %v515_v22 = vmul.f32 0.2, %v513_v20 }
 0x184   : > { %v516_v23 = vsel %vm514_vm2, %v513_v20, %v515_v22 }
 0x185   : > { %v519_v24 = vpack.c.bf16 %v516_v23, %v516_v23  ;;  %518 = vst.msk [vmem:[%s397_s23] sm:$0xff] %vm517_vm3, %v516_v23 }
 0x187   : > { %848 = vmatmul.mubr.msk.bf16.vlgmr.msra.gmra.mrb[0].mxu0 %vm517_vm3, %v519_v24 }
 0x188   : > { %1071 = shalt.err (!%p1068_p7)
}
 0x189   : > { %s1072_s14 = scalar_lea.hbm %s1463_s18, 128  ;;  %s1076_s21 = scalar_lea.hbm %s1544_s8, 256 }
 0x18a   : > { %p1073_p1 = scmp.ne.s32.totalorder %s1463_s18, %s1072_s14  ;;  %p1077_p0 = scmp.lt.u32.totalorder %s1463_s18, %s1544_s8 }
 0x18b   : > { %p1078_p9 = scmp.lt.u32.totalorder %s1076_s21, %s1072_s14  ;;  %p1080_p2 = scmp.lt.u32.totalorder %s1072_s14, %s1463_s18 }
 0x18c   : > { %p1074_p8 = pnand %p1073_p1, %p1572_p13 }
 0x18d   : > { %p1079_p12 = por %p1078_p9, %p1077_p0 }
 0x18e   : > { %p1075_p11 = pneg %p1074_p8 }
 0x18f   : > { %p1081_p6 = por %p1080_p2, %p1079_p12 }
 0x191   : > { %p1082_p10 = pnand %p1081_p6, %p1075_p11 }
 0x193   : > { %1085 = shalt.err (!%p1082_p10)
}
 0x194   : > { %864 = dma.vmem_to_hbm [thread:$0]  (%p1572_p13), %s642_s26, 128, %s1463_s18, %s615_s17   ;;  %v806_v25 = vld [vmem:[%s1542_s6] ss:$0 sm:$0xff] }
 0x195   : > { %s390_s15 = scalar_lea.vmem [#allocation10], %s1428_s5  ;;  %s1492_s17 = scalar_lea.hbm %s1543_s7, %s814_s10 }
 0x196   : > { %s628_s16 = sshll.u32 %s390_s15, 4  ;;  %s610_s13 = scalar_lea.sflag [#allocation4], %s1425_s25  ;;  %s1494_s16 = int_to_ptr.vmem [resolvable:$true] %s628_s16 }
 0x197   : > { %s1086_s19 = scalar_lea.vmem %s1494_s16, 128  ;;  %s1179_s5 = smov [#allocation10]  }
 0x198   : > { %p1087_p4 = scmp.ne.s32.totalorder %s1494_s16, %s1086_s19  ;;  %s1090_s9 = sshll.u32 %s1179_s5, 4  ;;  %s1091_s9 = int_to_ptr.vmem [resolvable:$false] %s1090_s9 }
 0x199   : > { %s1092_s14 = scalar_lea.vmem %s1091_s9, 256  ;;  %p1093_p7 = scmp.lt.s32.totalorder %s1494_s16, %s1091_s9 }
 0x19a   : > { %p1088_p5 = pnand %p1087_p4, %p1572_p13  ;;  %p1094_p1 = scmp.lt.s32.totalorder %s1092_s14, %s1086_s19 }
 0x19c   : > { %p1089_p3 = pneg %p1088_p5  ;;  %p1095_p8 = por %p1094_p1, %p1093_p7 }
 0x19e   : > { %p1096_p11 = pnand %p1095_p8, %p1089_p3 }
 0x25a   : > { %v596_v26 = vpop.f32.mrb[0].mxu0 }
 0x25b   : > { %v597_v27 = vadd.f32 %v806_v25, %v596_v26  ;;  %v849_v28 = vpop.f32.mrb[1].mxu0 }
 0x25c   : > { %v599_v29 = vpop.f32.mrb[2].mxu0 }
 0x25d   : > { %v602_v30 = vsub.f32 0.0, %v597_v27  ;;  %v850_v31 = vpop.f32.mrb[3].mxu0 }
 0x25f   : > { %v603_v32 = vmul.f32 1.442695, %v602_v30 }
 0x261   : > { %938 = vpow2.f32 %v603_v32 }
 0x26b   : > { %v939_v33 = vpop.eup %938 }
 0x26c   : > { %v605_v34 = vadd.f32 1.0, %v939_v33 }
 0x26e   : > { %940 = vrcp.f32 %v605_v34 }
 0x278   : > { %v941_v35 = vpop.eup %940 }
 0x279   : > { %608 = vst [vmem:[%s390_s15] sm:$0xff] %v941_v35 }
 0x27a   : > { %1099 = shalt.err (!%p1096_p11)
}
 0x27b   : > { %s1100_s25 = scalar_lea.hbm %s1492_s17, 128  ;;  %s1104_s29 = scalar_lea.hbm %s1543_s7, 256 }
 0x27c   : > { %p1101_p0 = scmp.ne.s32.totalorder %s1492_s17, %s1100_s25  ;;  %p1105_p2 = scmp.lt.u32.totalorder %s1492_s17, %s1543_s7 }
 0x27d   : > { %p1106_p6 = scmp.lt.u32.totalorder %s1104_s29, %s1100_s25  ;;  %p1108_p4 = scmp.lt.u32.totalorder %s1100_s25, %s1492_s17 }
 0x27e   : > { %p1102_p9 = pnand %p1101_p0, %p1572_p13 }
 0x27f   : > { %p1107_p10 = por %p1106_p6, %p1105_p2 }
 0x280   : > { %p1103_p12 = pneg %p1102_p9 }
 0x281   : > { %p1109_p5 = por %p1108_p4, %p1107_p10 }
 0x283   : > { %p1110_p3 = pnand %p1109_p5, %p1103_p12 }
 0x285   : > { %1113 = shalt.err (!%p1110_p3)
}
 0x286   : > { %863 = dma.vmem_to_hbm [thread:$0]  (%p1572_p13), %s1494_s16, 128, %s1492_s17, %s610_s13  }
 0x287 PF: > { %s653_s23 = sand.u32 1, %s1156_s27   ;;  %p1573_p7 = scmp.ne.s32.totalorder %s1556_s12, 0 }
 0x288   : > { %p1574_p1 = scmp.ge.s32.totalorder %s1168_s30, 2  ;;  %s654_s20 = scalar_lea.sflag [#allocation4], %s653_s23 }
 0x28a   : > { %p882_p8 = pnand %p1574_p1, %p1573_p7 }
 0x28c   : > { %1147 = dma.done.wait (!%p882_p8), %s654_s20, 128  }
 0x28d   : > { %1149 = vsyncadd (!%p882_p8), %s654_s20, 4294967168  ;;  %s663_s2 = scalar_lea.sflag [#allocation12], %s653_s23 }
 0x28e   : > { %1151 = dma.done.wait (!%p882_p8), %s663_s2, 128  }
 0x28f   : > { %1153 = vsyncadd (!%p882_p8), %s663_s2, 4294967168  ;;  %s1575_s30 = sld [smem:[#allocation20_spill]]  ;;  %s1576_s22 = sld [smem:[#allocation19_spill]] }
 0x290   : > { %s1577_s29 = sld [smem:[#allocation21_spill]]  ;;  %s1578_s27 = smov %s1160_s28 }
 0x295   : > { %p29_p13 = scmp.ge.s32.totalorder %s1575_s30, 4   ;;  %s1579_s28 = smov %s1576_s22 }
 0x297   :  { %31 = sbr.rel (!%p29_p13) target bundleno = 13 (0xd), region = 131 }
 0x29e   :  { %668 = vsyncpa [#allocation3], 1 }
 0x29f   :  { %670 = vsyncpa [#allocation3 + $0x1], 1 }
 0x2a0   :  { %671 = vsyncpa [#allocation6], 1 }
 0x2a1   :  { %673 = vsyncpa [#allocation6 + $0x1], 1 }
 0x2a2   :  { %674 = vsyncpa [#allocation9], 1 }
 0x2a3   :  { %675 = vsyncpa [#allocation4], 1 }
 0x2a4   :  { %677 = vsyncpa [#allocation4 + $0x1], 1 }
 0x2a5   :  { %678 = vsyncpa [#allocation12], 1 }
 0x2a6   :  { %680 = vsyncpa [#allocation12 + $0x1], 1 }

</bundles_post_ra>
